<compile_context>
chip_gen: v6e
topology: v6e:2x2x1
jax: 0.10.0
libtpu: 0.0.40
codegen_flags: <defaults>
</compile_context>

<pallas_src>
import functools
import math

import jax
import jax.numpy as jnp
from jax import lax
from jax.experimental import pallas as pl
from jax.experimental.pallas import tpu as pltpu


def _round_up(x, m):
    return (x + m - 1) // m * m


def _vmem_limit_bytes():
    # Generation-aware VMEM limit: ~75% of per-core VMEM, capped at 100 MiB.
    # Falls back to 48 MiB (safe on v5e / v6e / v7x) if the query is unavailable.
    try:
        cap = int(pltpu.get_tpu_info().vmem_capacity_bytes)
    except Exception:
        cap = 64 * 1024 * 1024
    return int(min(cap * 3 // 4, 100 * 1024 * 1024))


def _onehot_kernel(ids_ref, table_ref, o_ref, *, scale):
    # ids_ref: (tm, 1) int32 block; table_ref: (vocab, d_model) resident in VMEM;
    # o_ref: (tm, d_model).  One-hot row gather on the MXU (tiny vocab only).
    ids = ids_ref[...]                                    # (tm, 1)
    tm = ids.shape[0]
    vocab = table_ref.shape[0]

    iota = lax.broadcasted_iota(jnp.int32, (tm, vocab), 1)
    onehot = (iota == ids).astype(table_ref.dtype)        # (tm, vocab), exact 0/1
    rows = jnp.dot(onehot, table_ref[...],
                   preferred_element_type=jnp.float32,
                   precision=lax.Precision.HIGHEST)       # exact for f32 tables
    o_ref[...] = (rows * scale).astype(o_ref.dtype)


def _gather_kernel(ids_ref, table_ref, o_ref, *, scale, tm):
    # ids_ref: (m_pad,) int32 in SMEM (scalar prefetch); table_ref: (vocab, d_model)
    # resident in VMEM; o_ref: (tm, d_model).  Exact per-row gather, no matmul.
    base = pl.program_id(0) * tm

    def body(r, carry):
        tok = ids_ref[base + r]                           # SMEM scalar read
        row = table_ref[pl.ds(tok, 1), :]                 # (1, d_model) dynamic row
        o_ref[pl.ds(r, 1), :] = (row * scale).astype(o_ref.dtype)
        return carry

    lax.fori_loop(0, tm, body, 0, unroll=8)               # tm is a multiple of 8


@functools.partial(jax.jit, static_argnames=("block_rows", "onehot_vocab_limit"))
def embeddings_forward(token_ids, table, *, block_rows=512, onehot_vocab_limit=256):
    """token_ids: int array (...,); table: (vocab, d_model).

    Returns table[token_ids] * sqrt(d_model), shape (..., d_model), matching
    Embeddings.forward in the PyTorch module.
    """
    vocab, d_model = table.shape
    scale = math.sqrt(d_model)

    flat = token_ids.reshape(-1).astype(jnp.int32)
    m = flat.shape[0]

    # Row tiling: minimise pad waste and keep >= 2 grid steps (v7x megacore).
    nblocks = pl.cdiv(m, block_rows)
    if m >= 16:
        nblocks = max(nblocks, 2)
    tm = _round_up(pl.cdiv(m, nblocks), 8)
    m_pad = nblocks * tm
    if m_pad != m:
        flat = jnp.pad(flat, (0, m_pad - m))   # pad with 0 (valid index), sliced off below

    grid = (nblocks,)
    itemsize = table.dtype.itemsize
    use_onehot = vocab <= onehot_vocab_limit

    bytes_accessed = (vocab * d_model * itemsize        # table (read once)
                      + m_pad * 4                       # token ids
                      + m_pad * d_model * itemsize)     # output

    # Single resident copy of the table in VMEM (no double-buffering).
    table_spec = pl.BlockSpec(memory_space=pltpu.MemorySpace.VMEM)
    out_shape = jax.ShapeDtypeStruct((m_pad, d_model), table.dtype)
    compiler_params = pltpu.CompilerParams(
        dimension_semantics=("parallel",),
        vmem_limit_bytes=_vmem_limit_bytes(),
    )

    if use_onehot:
        cost = pl.CostEstimate(flops=2 * m_pad * vocab * d_model,
                               transcendentals=0,
                               bytes_accessed=bytes_accessed)
        out = pl.pallas_call(
            functools.partial(_onehot_kernel, scale=scale),
            out_shape=out_shape,
            grid_spec=pltpu.PrefetchScalarGridSpec(
                num_scalar_prefetch=0,
                grid=grid,
                in_specs=[
                    pl.BlockSpec((tm, 1), lambda i: (i, 0)),   # token ids block
                    table_spec,                                # resident table
                ],
                out_specs=pl.BlockSpec((tm, d_model), lambda i: (i, 0)),
            ),
            compiler_params=compiler_params,
            cost_estimate=cost,
        )(flat.reshape(m_pad, 1), table)
    else:
        cost = pl.CostEstimate(flops=0,                        # it's a gather, not a matmul
                               transcendentals=0,
                               bytes_accessed=bytes_accessed)
        out = pl.pallas_call(
            functools.partial(_gather_kernel, scale=scale, tm=tm),
            out_shape=out_shape,
            grid_spec=pltpu.PrefetchScalarGridSpec(
                num_scalar_prefetch=1,                         # token ids -> SMEM
                grid=grid,
                in_specs=[table_spec],                         # resident table
                out_specs=pl.BlockSpec((tm, d_model), lambda i, ids: (i, 0)),
            ),
            compiler_params=compiler_params,
            cost_estimate=cost,
        )(flat, table)

    return out[:m].reshape(token_ids.shape + (d_model,))


def _ref_embeddings(token_ids, table):
    d_model = table.shape[1]
    return table[token_ids] * math.sqrt(d_model)


if __name__ == "__main__":
    # Small shapes consistent with the module: d_model=512, vocab (max_seq_len)=64.
    batch, seq, max_seq_len, d_model = 2, 8, 64, 512

    key = jax.random.PRNGKey(0)
    k_ids, k_tab = jax.random.split(key)

    token_ids = jax.random.randint(k_ids, (batch, seq), 0, max_seq_len,
                                   dtype=jnp.int32)
    # nn.Embedding default init: N(0, 1)
    table = jax.random.normal(k_tab, (max_seq_len, d_model), dtype=jnp.float32)

    ref = _ref_embeddings(token_ids, table)

    # Path 1: tiny-vocab one-hot MXU path (default threshold selects it here).
    out_mxu = jax.block_until_ready(embeddings_forward(token_ids, table))
    assert out_mxu.shape == (batch, seq, d_model)
    assert jnp.allclose(out_mxu, ref, atol=1e-5, rtol=1e-5), "one-hot path mismatch"

    # Path 2: direct per-row gather path (forced), used for larger vocabularies.
    out_gather = jax.block_until_ready(
        embeddings_forward(token_ids, table, onehot_vocab_limit=0))
    assert out_gather.shape == (batch, seq, d_model)
    assert jnp.allclose(out_gather, ref, atol=1e-5, rtol=1e-5), "gather path mismatch"

    print("KERNEL_OK")
</pallas_src>

<mosaic_0001>
module attributes {stable_mosaic.version = 11 : i64} {
  func.func @_onehot_kernel(%arg0: i32, %arg1: memref<8x1xi32, #tpu.memory_space<vmem>>, %arg2: memref<64x512xf32, #tpu.memory_space<vmem>>, %arg3: memref<8x512xf32, #tpu.memory_space<vmem>>) attributes {dimension_semantics = [#tpu.dimension_semantics<parallel>], iteration_bounds = array<i64: 2>, scalar_prefetch = 0 : i64, scratch_operands = 0 : i64, tpu.core_type = #tpu.core_type<tc>, window_params = [{transform_indices = @transform_0, window_bounds = array<i64: 8, 1>}, {pipeline_mode = #tpu.pipeline_mode<synchronous>, transform_indices = @transform_1, window_bounds = array<i64: 64, 512>}, {transform_indices = @transform_2, window_bounds = array<i64: 8, 512>}]} {
    %c0 = arith.constant 0 : index
    %c0_0 = arith.constant 0 : index
    %0 = vector.load %arg1[%c0, %c0_0] : memref<8x1xi32, #tpu.memory_space<vmem>>, vector<8x1xi32>
    %1 = tpu.iota {dimensions = array<i32: 1>} : vector<8x64xi32>
    %2 = vector.broadcast %0 : vector<8x1xi32> to vector<8x64xi32>
    %3 = arith.cmpi eq, %1, %2 : vector<8x64xi32>
    %4 = arith.extui %3 : vector<8x64xi1> to vector<8x64xi32>
    %5 = arith.sitofp %4 : vector<8x64xi32> to vector<8x64xf32>
    %c0_1 = arith.constant 0 : index
    %c0_2 = arith.constant 0 : index
    %6 = vector.load %arg2[%c0_1, %c0_2] : memref<64x512xf32, #tpu.memory_space<vmem>>, vector<64x512xf32>
    %cst = arith.constant dense<0.000000e+00> : vector<8x512xf32>
    %7 = tpu.matmul %5, %6, %cst {dimension_numbers = #tpu.dot_dimension_numbers<[1], [0], [0], [1], [0, 0, 1, 1], [], []>, precision = #tpu.contract_precision<fp32>} : vector<8x64xf32>, vector<64x512xf32>, vector<8x512xf32> -> vector<8x512xf32>
    %cst_3 = arith.constant 22.6274166 : f32
    %8 = vector.broadcast %cst_3 : f32 to vector<8x512xf32>
    %9 = arith.mulf %7, %8 : vector<8x512xf32>
    %c0_4 = arith.constant 0 : index
    %c0_5 = arith.constant 0 : index
    %10 = vector.load %arg3[%c0_4, %c0_5] : memref<8x512xf32, #tpu.memory_space<vmem>>, vector<8x512xf32>
    tpu.vector_store %arg3[%c0_4, %c0_5], %9 {strides = array<i32>} : memref<8x512xf32, #tpu.memory_space<vmem>>, vector<8x512xf32>,
    return
  }
  func.func @transform_0(%arg0: i32) -> (i32, i32) {
    %c0_i32 = arith.constant 0 : i32
    %c0_i32_0 = arith.constant 0 : i32
    return %arg0, %c0_i32 : i32, i32
  }
  func.func @transform_1(%arg0: i32) -> (i32, i32) {
    %c0_i32 = arith.constant 0 : i32
    %c0_i32_0 = arith.constant 0 : i32
    %c0_i32_1 = arith.constant 0 : i32
    return %c0_i32, %c0_i32_0 : i32, i32
  }
  func.func @transform_2(%arg0: i32) -> (i32, i32) {
    %c0_i32 = arith.constant 0 : i32
    %c0_i32_0 = arith.constant 0 : i32
    return %arg0, %c0_i32 : i32, i32
  }
}

</mosaic_0001>

<bundles_post_ra>
// kernel: embeddings_forward.1
= control target key start
LH: loop header
LB: loop body
LE: loop exit
PB: predicated region body
PF: predicated region fallthrough
CT: control target
= control target key end

     0   :  { %7 = vsyncpa [#allocation3], 0  ;;  %s2419_s0 = inlined_call_operand.vmem [shape: s32[16,1], index: 0, kind: input, shape index: {}]   ;;  %s2420_s1 = inlined_call_operand.hbm [shape: f32[64,512], index: 1, kind: input, shape index: {}]   ;;  %s2421_s2 = inlined_call_operand.hbm [shape: f32[16,512], index: 2, kind: output, shape index: {}]  }
   0x1   :  { %8 = vsyncpa [#allocation4], 0 }
   0x2   :  { %10 = vsyncpa [#allocation4 + $0x1], 0  ;;  %s1776_s9 = smov 0   ;;  %s1778_s10 = smov 0  }
   0x3   :  { %s1780_s11 = smov 0   ;;  %s1782_s12 = smov 0  }
   0x4 LB: > { %s1797_s13 = sadd.s32 4294967295, %s1753_s12   ;;  %s1587_s14 = sadd.s32 4294967294, %s1753_s12   ;;  %s1753_s12 = sphi %s1782_s12, %s2470_s12   ;;  %s1749_s11 = sphi %s1780_s11, %s2469_s11   ;;  %s1745_s10 = sphi %s1778_s10, %s2468_s10   ;;  %s1741_s9 = sphi %s1776_s9, %s2467_s9  }
   0x5   : > { %s1801_s15 = sadd.s32 1, %s1753_s12   ;;  %s70_s16 = sadd.s32 1, %s1749_s11 }
   0x6   : > { %s67_s17 = ssub.s32 %s1753_s12, %s1801_s15  ;;  %p80_p0 = scmp.ne.s32.totalorder %s1749_s11, %s1745_s10 }
   0x7   : > { %p68_p1 = scmp.eq.s32.totalorder %s67_s17, 0  ;;  %p81_p2 = scmp.eq.s32.totalorder %s1797_s13, 1 }
   0x8   : > { %p86_p3 = scmp.ne.s32.totalorder %s1745_s10, %s1741_s9  ;;  %p87_p4 = scmp.eq.s32.totalorder %s1587_s14, 1 }
   0x9   : > { %s1812_s18 = scalar_select %p68_p1, %s1749_s11, %s70_s16  }
   0xa   : > { %p1814_p5 = por %p81_p2, %p80_p0  ;;  %p1818_p6 = por %p87_p4, %p86_p3 }
   0xb   : > { %p1588_p7 = scmp.ge.s32.totalorder %s1753_s12, 1  ;;  %p94_p8 = scmp.lt.s32.totalorder %s1753_s12, 3 }
   0xc   : > { %s2444_s20 = scalar_select %p1818_p6, 1, 0 }
   0xd   : > { %p1622_p9 = scmp.eq.s32.totalorder %s1797_s13, 0  ;;  %p1825_p10 = pnand %p1588_p7, %p94_p8 }
   0xe   : > { %s1755_s22 = smov [#allocation2]  }
   0xf   : > { %s106_s23 = sshll.u32 %s1755_s22, 4  ;;  %p1614_p11 = pneg %p1825_p10  ;;  %s107_s23 = int_to_ptr.vmem [resolvable:$true] %s106_s23 }
  0x10   : > { %s1674_s24 = scalar_lea.vmem %s107_s23, 4096  ;;  %p1682_p3 = scmp.lt.s32.totalorder %s107_s23, %s107_s23 }
  0x11   : > { %p1615_p12 = pnand %p1622_p9, %p1614_p11  ;;  %p1675_p0 = scmp.ne.s32.totalorder %s107_s23, %s1674_s24 }
  0x12   : > { %p1683_p4 = scmp.lt.s32.totalorder %s1674_s24, %s1674_s24 }
  0x13   : > { %p1665_p13 = pneg %p1615_p12 }
  0x14   : > { %p1684_p6 = por %p1683_p4, %p1682_p3 }
  0x15   : > { %p1677_p1 = pnand %p1675_p0, %p1665_p13 }
  0x17   : > { %p1678_p2 = pneg %p1677_p1 }
  0x19   : > { %p1685_p7 = pnand %p1684_p6, %p1678_p2 }
  0x1b   : > { %1688 = shalt.err (!%p1685_p7)
}
  0x1c   : > { %s1756_s25 = smov 512   ;;  %s1757_s26 = smov 32  }
  0x1d   : > { %1617 = dma.hbm_to_vmem [thread:$0]  (!%p1615_p12), %s2420_s1, 4096, %s107_s23, [#allocation3], %s1756_s25, %s1756_s25, %s1757_s26  }
  0x1e   : > { %129 = sbr.rel (%p1825_p10) target bundleno = 480 (0x1e0), region = 28 }
  0x23   : > { %1732 = dma.done.wait (%p1622_p9), [#allocation3], 4096  }
  0x24   : > { %1734 = vsyncadd (%p1622_p9), [#allocation3], 4294963200  ;;  %p150_p8 = scmp.lt.s32.totalorder %s1797_s13, 1  ;;  %v1758_v0 = vmov 0   ;;  %v2433_v1 = vmov 0.0   ;;  %v192_v3 = vld [vmem:[#allocation2 + $0xe8] sm:$0xff] }
  0x25   : > { %1662 = vset.pattern.permute.xlu0 %v1758_v0  ;;  %435 = vmatprep.mubr.f32.mxu1 %v2433_v1  ;;  %v191_v4 = vld [vmem:[#allocation2 + $0xe0] sm:$0xff]  ;;  %v1849_v5 = vand.u32 4294901760, %v192_v3  ;;  %v188_v7 = vld [vmem:[#allocation2 + $0xc8] sm:$0xff]  ;;  %vm195_vm0 = vcmask 523264   ;;  %s147_s6 = sand.u32 1, %s1745_s10   ;;  %s1607_s14 = sshll.u32 %s1797_s13, 9 }
  0x26   : > { %s151_s29 = scalar_select %p150_p8, %s1797_s13, 1  ;;  %279 = vmatprep.mubr.f32.mxu0 %v2433_v1  ;;  %v1851_v6 = vand.u32 4294901760, %v191_v4  ;;  %v187_v8 = vld [vmem:[#allocation2 + $0xc0] sm:$0xff]  ;;  %v184_v9 = vld [vmem:[#allocation2 + $0xa8] sm:$0xff]  ;;  %v1853_v10 = vand.u32 4294901760, %v188_v7 }
  0x27   : > { %v1855_v11 = vand.u32 4294901760, %v187_v8  ;;  %v1857_v12 = vand.u32 4294901760, %v184_v9  ;;  %v183_v13 = vld [vmem:[#allocation2 + $0xa0] sm:$0xff]  ;;  %v180_v14 = vld [vmem:[#allocation2 + $0x88] sm:$0xff]  ;;  %v1860_v16 = vsub.f32 %v192_v3, %v1849_v5  ;;  %216 = vmatprep.subr.mxu0 %v1849_v5  ;;  %s1593_s7 = sshll.u32 %s147_s6, 5  ;;  %s1514_s22 = scalar_lea.hbm %s2421_s2, %s1607_s14 }
  0x28   : > { %s1594_s30 = sshll.u32 %s151_s29, 3  ;;  %v179_v15 = vld [vmem:[#allocation2 + $0x80] sm:$0xff]  ;;  %v1863_v17 = vsub.f32 %v191_v4, %v1851_v6  ;;  %v1865_v18 = vand.u32 4294901760, %v183_v13  ;;  %v1867_v19 = vand.u32 4294901760, %v180_v14  ;;  %v1871_v20 = vsub.f32 %v188_v7, %v1853_v10  ;;  %218 = vmatpush1.msra.mxu0 %v1851_v6  ;;  %v176_v40 = vld [vmem:[#allocation2 + $0x68] sm:$0xff]  ;;  %s2377_s8 = scalar_lea.vmem [#allocation5], %s1593_s7 }
  0x29   : > { %s153_s5 = scalar_lea.vmem %s2419_s0, %s1594_s30  ;;  %v1874_v21 = vsub.f32 %v187_v8, %v1855_v11  ;;  %v1877_v22 = vsub.f32 %v184_v9, %v1857_v12  ;;  %v1879_v23 = vand.u32 4294901760, %v179_v15  ;;  %v309_v24 = vand.u32 4294901760, %v1860_v16  ;;  %220 = vmatprep.subr.mxu0 %v1853_v10  ;;  %v175_v41 = vld [vmem:[#allocation2 + $0x60] sm:$0xff]  ;;  %v172_v46 = vld [vmem:[#allocation2 + $0x48] sm:$0xff]  ;;  %s1516_s16 = sshll.u32 %s2377_s8, 4  ;;  %s1517_s16 = int_to_ptr.vmem [resolvable:$true] %s1516_s16 }
  0x2a   : > { %v154_v2 = vld [vmem:[%s153_s5] sm:$0xff]  ;;  %v315_v25 = vand.u32 4294901760, %v1863_v17  ;;  %v1885_v26 = vsub.f32 %v183_v13, %v1865_v18  ;;  %v1888_v27 = vsub.f32 %v180_v14, %v1867_v19  ;;  %v321_v28 = vand.u32 4294901760, %v1871_v20  ;;  %222 = vmatpush1.msra.mxu0 %v1855_v11  ;;  %v168_v48 = vld [vmem:[#allocation2 + $0x28] sm:$0xff]  ;;  %s1502_s23 = scalar_lea.sflag [#allocation4], %s147_s6  ;;  %s1689_s24 = scalar_lea.vmem %s1517_s16, 512 }
  0x2b   : > { %158 = vperm.xlu0 %1662, %v154_v2   ;;  %v327_v29 = vand.u32 4294901760, %v1874_v21  ;;  %v333_v30 = vand.u32 4294901760, %v1877_v22  ;;  %v1895_v31 = vsub.f32 %v179_v15, %v1879_v23  ;;  %v310_v32 = vsub.f32 %v1860_v16, %v309_v24  ;;  %224 = vmatprep.subr.mxu0 %v1857_v12  ;;  %v171_v47 = vld [vmem:[#allocation2 + $0x40] sm:$0xff]  ;;  %v164_v54 = vld [vmem:[#allocation2 + $0x8] sm:$0xff]  ;;  %p1690_p6 = scmp.ne.s32.totalorder %s1517_s16, %s1689_s24  ;;  %s1760_s25 = smov [#allocation5]  }
  0x2c   : > { %v316_v33 = vsub.f32 %v1863_v17, %v315_v25  ;;  %v2435_v34 = vand.u32 4294901760, %v1885_v26  ;;  %v2431_v35 = vand.u32 4294901760, %v1888_v27  ;;  %v322_v36 = vsub.f32 %v1871_v20, %v321_v28  ;;  %226 = vmatpush1.msra.mxu0 %v1865_v18  ;;  %v167_v53 = vld [vmem:[#allocation2 + $0x20] sm:$0xff]  ;;  %s1693_s13 = sshll.u32 %s1760_s25, 4  ;;  %s1694_s13 = int_to_ptr.vmem [resolvable:$false] %s1693_s13 }
  0x2d   : > { %v328_v37 = vsub.f32 %v1874_v21, %v327_v29  ;;  %v334_v38 = vsub.f32 %v1877_v22, %v333_v30  ;;  %v2430_v39 = vand.u32 4294901760, %v1895_v31  ;;  %v311_v42 = vand.u32 4294901760, %v310_v32  ;;  %228 = vmatprep.subr.mxu0 %v1867_v19  ;;  %v163_v59 = vld [vmem:[#allocation2] sm:$0xff]  ;;  %p1691_p9 = pnand %p1690_p6, %p1814_p5  ;;  %s1695_s26 = scalar_lea.vmem %s1694_s13, 1024 }
  0x2e   : > { %v317_v43 = vand.u32 4294901760, %v316_v33  ;;  %v340_v44 = vsub.f32 %v1885_v26, %v2435_v34  ;;  %v346_v45 = vsub.f32 %v1888_v27, %v2431_v35  ;;  %v323_v49 = vand.u32 4294901760, %v322_v36  ;;  %230 = vmatpush1.msra.mxu0 %v1879_v23  ;;  %v170_v35 = vld [vmem:[#allocation2 + $0x38] sm:$0xff]  ;;  %p1696_p11 = scmp.lt.s32.totalorder %s1517_s16, %s1694_s13  ;;  %p1697_p12 = scmp.lt.s32.totalorder %s1695_s26, %s1689_s24 }
  0x2f   : > { %v329_v50 = vand.u32 4294901760, %v328_v37  ;;  %v335_v51 = vand.u32 4294901760, %v334_v38  ;;  %v352_v52 = vsub.f32 %v1895_v31, %v2430_v39  ;;  %312 = vmatprep.subr.mxu1 %v311_v42  ;;  %v1929_v57 = vand.u32 4294901760, %v176_v40  ;;  %p1692_p10 = pneg %p1691_p9 }
  0x30   : > { %v341_v55 = vand.u32 4294901760, %v340_v44  ;;  %v347_v56 = vand.u32 4294901760, %v346_v45  ;;  %v1931_v58 = vand.u32 4294901760, %v175_v41  ;;  %318 = vmatpush1.msra.mxu1 %v317_v43  ;;  %v1933_v61 = vand.u32 4294901760, %v172_v46  ;;  %p1698_p13 = por %p1697_p12, %p1696_p11 }
  0x31   : > { %v353_v60 = vand.u32 4294901760, %v352_v52  ;;  %v1935_v62 = vand.u32 4294901760, %v171_v47  ;;  %v1937_v63 = vand.u32 4294901760, %v168_v48  ;;  %324 = vmatprep.subr.mxu1 %v323_v49  ;;  %v1940_v0 = vsub.f32 %v176_v40, %v1929_v57  ;;  %232 = vmatprep.subr.mxu0 %v1929_v57 }
  0x32   : > { %v1943_v2 = vsub.f32 %v175_v41, %v1931_v58  ;;  %v1945_v3 = vand.u32 4294901760, %v167_v53  ;;  %v1947_v4 = vand.u32 4294901760, %v164_v54  ;;  %330 = vmatpush1.msra.mxu1 %v329_v50  ;;  %v1951_v7 = vsub.f32 %v172_v46, %v1933_v61  ;;  %234 = vmatpush1.msra.mxu0 %v1931_v58  ;;  %p1699_p0 = pnand %p1698_p13, %p1692_p10 }
  0x33   : > { %v1954_v8 = vsub.f32 %v171_v47, %v1935_v62  ;;  %v1957_v9 = vsub.f32 %v168_v48, %v1937_v63  ;;  %v1959_v13 = vand.u32 4294901760, %v163_v59  ;;  %336 = vmatprep.subr.mxu1 %v335_v51  ;;  %v2429_v14 = vand.u32 4294901760, %v1940_v0  ;;  %236 = vmatprep.subr.mxu0 %v1933_v61 }
  0x34   : > { %v2428_v15 = vand.u32 4294901760, %v1943_v2  ;;  %v1965_v32 = vsub.f32 %v167_v53, %v1945_v3  ;;  %v1968_v33 = vsub.f32 %v164_v54, %v1947_v4  ;;  %342 = vmatpush1.msra.mxu1 %v341_v55  ;;  %v2427_v36 = vand.u32 4294901760, %v1951_v7  ;;  %238 = vmatpush1.msra.mxu0 %v1935_v62 }
  0x35   : > { %v2426_v37 = vand.u32 4294901760, %v1954_v8  ;;  %v2425_v38 = vand.u32 4294901760, %v1957_v9  ;;  %v1975_v40 = vsub.f32 %v163_v59, %v1959_v13  ;;  %348 = vmatprep.subr.mxu1 %v347_v56  ;;  %v358_v41 = vsub.f32 %v1940_v0, %v2429_v14  ;;  %240 = vmatprep.subr.mxu0 %v1937_v63  ;;  %v173_v14 = vld [vmem:[#allocation2 + $0x50] sm:$0xff] }
  0x36   : > { %v364_v42 = vsub.f32 %v1943_v2, %v2428_v15  ;;  %v2424_v43 = vand.u32 4294901760, %v1965_v32  ;;  %v2423_v44 = vand.u32 4294901760, %v1968_v33  ;;  %354 = vmatpush1.msra.mxu1 %v353_v60  ;;  %v370_v45 = vsub.f32 %v1951_v7, %v2427_v36  ;;  %242 = vmatpush1.msra.mxu0 %v1945_v3  ;;  %v177_v36 = vld [vmem:[#allocation2 + $0x70] sm:$0xff]  ;;  %v174_v15 = vld [vmem:[#allocation2 + $0x58] sm:$0xff] }
  0x37   : > { %v376_v46 = vsub.f32 %v1954_v8, %v2426_v37  ;;  %v382_v47 = vsub.f32 %v1957_v9, %v2425_v38  ;;  %v2422_v48 = vand.u32 4294901760, %v1975_v40  ;;  %v359_v49 = vand.u32 4294901760, %v358_v41  ;;  %244 = vmatprep.subr.mxu0 %v1947_v4  ;;  %v178_v38 = vld [vmem:[#allocation2 + $0x78] sm:$0xff] }
  0x38   : > { %v365_v50 = vand.u32 4294901760, %v364_v42  ;;  %v388_v51 = vsub.f32 %v1965_v32, %v2424_v43  ;;  %v394_v52 = vsub.f32 %v1968_v33, %v2423_v44  ;;  %v371_v53 = vand.u32 4294901760, %v370_v45  ;;  %246 = vmatpush1.msra.mxu0 %v1959_v13  ;;  %v181_v44 = vld [vmem:[#allocation2 + $0x90] sm:$0xff] }
  0x39   : > { %v377_v54 = vand.u32 4294901760, %v376_v46  ;;  %v400_v55 = vsub.f32 %v1975_v40, %v2422_v48  ;;  %360 = vmatprep.subr.mxu1 %v359_v49  ;;  %v383_v56 = vand.u32 4294901760, %v382_v47  ;;  %461 = vmatprep.subr.mxu0 %v1860_v16  ;;  %v155_v42 = vlaneseq  ;;  %v182_v48 = vld [vmem:[#allocation2 + $0x98] sm:$0xff] }
  0x3a   : > { %366 = vmatpush1.msra.mxu1 %v365_v50  ;;  %v389_v59 = vand.u32 4294901760, %v388_v51  ;;  %v395_v60 = vand.u32 4294901760, %v394_v52  ;;  %v2084_v37 = vand.u32 4294901760, %v182_v48  ;;  %v2117_v39 = vand.u32 4294901760, %v177_v36 }
  0x3b   : > { %372 = vmatprep.subr.mxu1 %v371_v53  ;;  %v401_v41 = vand.u32 4294901760, %v400_v55  ;;  %v156_v45 = vand.u32 127, %v155_v42  ;;  %v2135_v16 = vand.u32 4294901760, %v173_v14 }
  0x3c   : > { %378 = vmatpush1.msra.mxu1 %v377_v54  ;;  %v194_v54 = vld [vmem:[#allocation2 + $0xf8] sm:$0xff] }
  0x3d   : > { %384 = vmatprep.subr.mxu1 %v383_v56  ;;  %v2044_v55 = vand.u32 4294901760, %v194_v54  ;;  %v193_v56 = vld [vmem:[#allocation2 + $0xf0] sm:$0xff] }
  0x3e   : > { %390 = vmatpush1.msra.mxu1 %v389_v59  ;;  %v190_v59 = vld [vmem:[#allocation2 + $0xd8] sm:$0xff]  ;;  %v2057_v42 = vand.u32 4294901760, %v193_v56 }
  0x3f   : > { %396 = vmatprep.subr.mxu1 %v395_v60  ;;  %v189_v60 = vld [vmem:[#allocation2 + $0xd0] sm:$0xff] }
  0x40   : > { %402 = vmatpush1.msra.mxu1 %v401_v41  ;;  %v2055_v41 = vsub.f32 %v194_v54, %v2044_v55 }
  0x41   : > { %565 = vmatprep.subr.mxu1 %v1849_v5 }
  0xa6   : > { %v159_v46 = vpop.permute.xlu0 %158 }
  0xa7   : > { %vm160_vm1 = vcmp.eq.s32.totalorder %v156_v45, %v159_v46  ;;  %v186_v45 = vld [vmem:[#allocation2 + $0xb8] sm:$0xff]  ;;  %v2061_v46 = vand.u32 4294901760, %v190_v59 }
  0xa8   : > { %v2012_v47 = vsel %vm160_vm1, 1.0, %v2433_v1  ;;  %v2069_v54 = vand.u32 4294901760, %v186_v45 }
  0xa9   : > { %1596 = vmatmul.mubr.msk.f32.vlgmr.msra.gmra.mxu1 %vm195_vm0, %v2012_v47  ;;  %v197_v49 = vsel %vm195_vm0, %v2012_v47, 0 }
  0xaa   : > { %567 = vmatpush1.msra.mxu1 %v1851_v6  ;;  %v2019_v50 = vsub.f32 %v197_v49, %v197_v49  ;;  %628 = vmatprep.mubr.f32.mxu1 %v2433_v1  ;;  %v185_v49 = vld [vmem:[#allocation2 + $0xb0] sm:$0xff] }
  0xab   : > { %569 = vmatprep.subr.mxu1 %v1853_v10  ;;  %v2077_v43 = vand.u32 4294901760, %v185_v49 }
  0xac   : > { %571 = vmatpush1.msra.mxu1 %v1855_v11  ;;  %v2025_v51 = vand.u32 4294901760, %v2019_v50 }
  0xad   : > { %573 = vmatprep.subr.mxu1 %v1857_v12 }
  0xae   : > { %575 = vmatpush1.msra.mxu1 %v1865_v18  ;;  %v283_v52 = vsub.f32 %v2019_v50, %v2025_v51 }
  0xaf   : > { %577 = vmatprep.subr.mxu1 %v1867_v19 }
  0xb0   : > { %579 = vmatpush1.msra.mxu1 %v1879_v23  ;;  %v2033_v53 = vand.u32 4294901760, %v283_v52  ;;  %v2065_v52 = vand.u32 4294901760, %v189_v60 }
  0xb1   : > { %581 = vmatprep.subr.mxu1 %v1929_v57 }
  0xb2   : > { %583 = vmatpush1.msra.mxu1 %v1931_v58  ;;  %285 = vmatmul.mubr.f32.vlgmr.msra.gmra.mxu0 %v2033_v53 }
  0xb3   : > { %464 = vmatpush1.msra.mxu0 %v1863_v17  ;;  %585 = vmatprep.subr.mxu1 %v1933_v61 }
  0xb4   : > { %467 = vmatprep.subr.mxu0 %v1871_v20  ;;  %587 = vmatpush1.msra.mxu1 %v1935_v62 }
  0xb5   : > { %470 = vmatpush1.msra.mxu0 %v1874_v21  ;;  %589 = vmatprep.subr.mxu1 %v1937_v63 }
  0xb6   : > { %473 = vmatprep.subr.mxu0 %v1877_v22  ;;  %591 = vmatpush1.msra.mxu1 %v1945_v3 }
  0xb7   : > { %476 = vmatpush1.msra.mxu0 %v1885_v26  ;;  %593 = vmatprep.subr.mxu1 %v1947_v4 }
  0xb8   : > { %479 = vmatprep.subr.mxu0 %v1888_v27  ;;  %595 = vmatpush1.msra.mxu1 %v1959_v13 }
  0xb9   : > { %482 = vmatpush1.msra.mxu0 %v1895_v31  ;;  %632 = vmatmul.mubr.f32.vlgmr.msra.gmra.mxu1 %v2025_v51 }
  0xba   : > { %775 = vmatprep.subr.mxu1 %v1849_v5  ;;  %485 = vmatprep.subr.mxu0 %v1940_v0  ;;  %v2432_v5 = vand.u32 4294901760, %v2055_v41 }
  0xbb   : > { %777 = vmatpush1.msra.mxu1 %v1851_v6  ;;  %488 = vmatpush1.msra.mxu0 %v1943_v2  ;;  %v2075_v6 = vsub.f32 %v193_v56, %v2057_v42  ;;  %v2091_v56 = vand.u32 4294901760, %v181_v44 }
  0xbc   : > { %779 = vmatprep.subr.mxu1 %v1853_v10  ;;  %491 = vmatprep.subr.mxu0 %v1951_v7  ;;  %v2082_v10 = vsub.f32 %v190_v59, %v2061_v46  ;;  %v2098_v59 = vand.u32 4294901760, %v178_v38 }
  0xbd   : > { %781 = vmatpush1.msra.mxu1 %v1855_v11  ;;  %494 = vmatpush1.msra.mxu0 %v1954_v8  ;;  %v2089_v11 = vsub.f32 %v189_v60, %v2065_v52  ;;  %v962_v60 = vand.u32 4294901760, %v2075_v6 }
  0xbe   : > { %783 = vmatprep.subr.mxu1 %v1857_v12  ;;  %497 = vmatprep.subr.mxu0 %v1957_v9  ;;  %v2096_v12 = vsub.f32 %v186_v45, %v2069_v54  ;;  %v2436_v45 = vand.u32 4294901760, %v2082_v10  ;;  %v2133_v34 = vsub.f32 %v178_v38, %v2098_v59  ;;  %v165_v38 = vld [vmem:[#allocation2 + $0x10] sm:$0xff] }
  0xbf   : > { %785 = vmatpush1.msra.mxu1 %v1865_v18  ;;  %500 = vmatpush1.msra.mxu0 %v1965_v32  ;;  %v2105_v18 = vsub.f32 %v2055_v41, %v2432_v5  ;;  %v2124_v5 = vsub.f32 %v181_v44, %v2091_v56  ;;  %v963_v17 = vsub.f32 %v2075_v6, %v962_v60 }
  0xc0   : > { %787 = vmatprep.subr.mxu1 %v1867_v19  ;;  %503 = vmatprep.subr.mxu0 %v1968_v33  ;;  %v2109_v19 = vsub.f32 %v185_v49, %v2077_v43  ;;  %v2437_v49 = vand.u32 4294901760, %v2089_v11  ;;  %v969_v20 = vsub.f32 %v2082_v10, %v2436_v45 }
  0xc1   : > { %789 = vmatpush1.msra.mxu1 %v1879_v23  ;;  %506 = vmatpush1.msra.mxu0 %v1975_v40  ;;  %v2115_v23 = vsub.f32 %v182_v48, %v2084_v37  ;;  %v2438_v48 = vand.u32 4294901760, %v2096_v12  ;;  %v958_v44 = vand.u32 4294901760, %v2105_v18 }
  0xc2   : > { %539 = vmatprep.mubr.f32.mxu0 %v2433_v1  ;;  %791 = vmatprep.subr.mxu1 %v1929_v57  ;;  %v2126_v1 = vand.u32 4294901760, %v174_v15  ;;  %v169_v57 = vld [vmem:[#allocation2 + $0x30] sm:$0xff]  ;;  %v975_v21 = vsub.f32 %v2089_v11, %v2437_v49  ;;  %v2181_v49 = vand.u32 4294901760, %v165_v38 }
  0xc3   : > { %542 = vmatmul.mubr.f32.vlgmr.msra.gmra.mxu0 %v2019_v50  ;;  %657 = vmatprep.subr.mxu0 %v309_v24  ;;  %v166_v24 = vld [vmem:[#allocation2 + $0x18] sm:$0xff]  ;;  %v2157_v18 = vand.u32 4294901760, %v169_v57  ;;  %v981_v22 = vsub.f32 %v2096_v12, %v2438_v48  ;;  %v2448_v48 = vmov 0.0  }
  0xc4   : > { %793 = vmatpush1.msra.mxu1 %v1931_v58  ;;  %661 = vmatpush1.msra.mxu0 %v315_v25  ;;  %v2440_v25 = vand.u32 4294901760, %v2109_v19  ;;  %v2145_v58 = vand.u32 4294901760, %v170_v35  ;;  %v2169_v45 = vand.u32 4294901760, %v166_v24 }
  0xc5   : > { %795 = vmatprep.subr.mxu1 %v1933_v61  ;;  %665 = vmatprep.subr.mxu0 %v321_v28  ;;  %v2439_v28 = vand.u32 4294901760, %v2115_v23  ;;  %v2155_v61 = vsub.f32 %v177_v36, %v2117_v39  ;;  %v2446_v36 = vand.u32 4294901760, %v1885_v26 }
  0xc6   : > { %797 = vmatpush1.msra.mxu1 %v1935_v62  ;;  %669 = vmatpush1.msra.mxu0 %v327_v29  ;;  %v2441_v29 = vand.u32 4294901760, %v2124_v5  ;;  %v2167_v62 = vsub.f32 %v174_v15, %v2126_v1  ;;  %v2447_v15 = vand.u32 4294901760, %v1888_v27  ;;  %v987_v26 = vsub.f32 %v2109_v19, %v2440_v25 }
  0xc7   : > { %799 = vmatprep.subr.mxu1 %v1937_v63  ;;  %673 = vmatprep.subr.mxu0 %v333_v30  ;;  %v2442_v30 = vand.u32 4294901760, %v2133_v34  ;;  %v2179_v63 = vsub.f32 %v173_v14, %v2135_v16  ;;  %v970_v14 = vand.u32 4294901760, %v969_v20  ;;  %v1010_v27 = vand.u32 4294901760, %v2155_v61 }
  0xc8   : > { %801 = vmatpush1.msra.mxu1 %v1945_v3  ;;  %677 = vmatpush1.msra.mxu0 %v2446_v36  ;;  %v964_v3 = vand.u32 4294901760, %v963_v17  ;;  %v2190_v36 = vsub.f32 %v170_v35, %v2145_v58  ;;  %v2199_v17 = vsub.f32 %v169_v57, %v2157_v18  ;;  %v976_v35 = vand.u32 4294901760, %v975_v21 }
  0xc9   : > { %803 = vmatprep.subr.mxu1 %v1947_v4  ;;  %681 = vmatprep.subr.mxu0 %v2447_v15  ;;  %v993_v4 = vsub.f32 %v2115_v23, %v2439_v28  ;;  %v2449_v15 = vand.u32 4294901760, %v1895_v31  ;;  %v1016_v20 = vand.u32 4294901760, %v2167_v62  ;;  %v2210_v28 = vsub.f32 %v166_v24, %v2169_v45 }
  0xca   : > { %805 = vmatpush1.msra.mxu1 %v1959_v13  ;;  %838 = vmatprep.mubr.f32.mxu1 %v2448_v48  ;;  %v999_v13 = vsub.f32 %v2124_v5, %v2441_v29  ;;  %v2450_v57 = vand.u32 4294901760, %v1940_v0  ;;  %v982_v25 = vand.u32 4294901760, %v981_v22  ;;  %v1005_v31 = vsub.f32 %v2133_v34, %v2442_v30 }
  0xcb   : > { %685 = vmatpush1.msra.mxu0 %v2449_v15  ;;  %1598 = vmatmul.mubr.msk.f32.vlgmr.msra.gmra.mxu1 %vm195_vm0, %v2012_v47  ;;  %v1022_v21 = vand.u32 4294901760, %v2179_v63  ;;  %v2219_v15 = vsub.f32 %v165_v38, %v2181_v49  ;;  %v2451_v29 = vand.u32 4294901760, %v1943_v2  ;;  %v988_v24 = vand.u32 4294901760, %v987_v26 }
  0xcc   : > { %959 = vmatprep.subr.mxu1 %v958_v44  ;;  %689 = vmatprep.subr.mxu0 %v2450_v57  ;;  %v1028_v44 = vand.u32 4294901760, %v2190_v36  ;;  %v2452_v0 = vand.u32 4294901760, %v1951_v7  ;;  %v994_v22 = vand.u32 4294901760, %v993_v4  ;;  %v1011_v57 = vsub.f32 %v2155_v61, %v1010_v27 }
  0xcd   : > { %965 = vmatpush1.msra.mxu1 %v964_v3  ;;  %693 = vmatpush1.msra.mxu0 %v2451_v29  ;;  %v1034_v30 = vand.u32 4294901760, %v2199_v17  ;;  %v2453_v38 = vand.u32 4294901760, %v1954_v8  ;;  %v1000_v2 = vand.u32 4294901760, %v999_v13  ;;  %v1017_v29 = vsub.f32 %v2167_v62, %v1016_v20 }
  0xce   : > { %971 = vmatprep.subr.mxu1 %v970_v14  ;;  %697 = vmatprep.subr.mxu0 %v2452_v0  ;;  %v1040_v3 = vand.u32 4294901760, %v2210_v28  ;;  %v2454_v7 = vand.u32 4294901760, %v1957_v9  ;;  %v1006_v26 = vand.u32 4294901760, %v1005_v31  ;;  %v1023_v14 = vsub.f32 %v2179_v63, %v1022_v21 }
  0xcf   : > { %977 = vmatpush1.msra.mxu1 %v976_v35  ;;  %701 = vmatpush1.msra.mxu0 %v2453_v38  ;;  %v1046_v4 = vand.u32 4294901760, %v2219_v15  ;;  %v2455_v8 = vand.u32 4294901760, %v1965_v32  ;;  %v1029_v35 = vsub.f32 %v2190_v36, %v1028_v44  ;;  %v1012_v9 = vand.u32 4294901760, %v1011_v57 }
  0xd0   : > { %983 = vmatprep.subr.mxu1 %v982_v25  ;;  %705 = vmatprep.subr.mxu0 %v2454_v7  ;;  %v2456_v25 = vand.u32 4294901760, %v1968_v33  ;;  %v1035_v13 = vsub.f32 %v2199_v17, %v1034_v30  ;;  %v2457_v31 = vand.u32 4294901760, %v1975_v40  ;;  %v1041_v32 = vsub.f32 %v2210_v28, %v1040_v3 }
  0xd1   : > { %989 = vmatpush1.msra.mxu1 %v988_v24  ;;  %709 = vmatpush1.msra.mxu0 %v2455_v8  ;;  %v1018_v24 = vand.u32 4294901760, %v1017_v29  ;;  %v1024_v0 = vand.u32 4294901760, %v1023_v14  ;;  %v1047_v33 = vsub.f32 %v2219_v15, %v1046_v4  ;;  %v1030_v40 = vand.u32 4294901760, %v1029_v35 }
  0xd2   : > { %995 = vmatprep.subr.mxu1 %v994_v22  ;;  %713 = vmatprep.subr.mxu0 %v2456_v25  ;;  %v1036_v22 = vand.u32 4294901760, %v1035_v13  ;;  %v1042_v57 = vand.u32 4294901760, %v1041_v32 }
  0xd3   : > { %1001 = vmatpush1.msra.mxu1 %v1000_v2  ;;  %717 = vmatpush1.msra.mxu0 %v2457_v31  ;;  %v1048_v38 = vand.u32 4294901760, %v1047_v33 }
  0xd4   : > { %750 = vmatprep.mubr.f32.mxu0 %v2448_v48  ;;  %1007 = vmatprep.subr.mxu1 %v1006_v26 }
  0xd5   : > { %1597 = vmatmul.mubr.msk.f32.vlgmr.msra.gmra.mxu0 %vm195_vm0, %v2012_v47  ;;  %863 = vmatprep.subr.mxu0 %v2044_v55 }
  0xd6   : > { %1013 = vmatpush1.msra.mxu1 %v1012_v9  ;;  %865 = vmatpush1.msra.mxu0 %v2057_v42 }
  0xd7   : > { %1019 = vmatprep.subr.mxu1 %v1018_v24  ;;  %867 = vmatprep.subr.mxu0 %v2061_v46 }
  0xd8   : > { %1025 = vmatpush1.msra.mxu1 %v1024_v0  ;;  %869 = vmatpush1.msra.mxu0 %v2065_v52 }
  0xd9   : > { %1031 = vmatprep.subr.mxu1 %v1030_v40  ;;  %871 = vmatprep.subr.mxu0 %v2069_v54 }
  0xda   : > { %1037 = vmatpush1.msra.mxu1 %v1036_v22  ;;  %873 = vmatpush1.msra.mxu0 %v2077_v43 }
  0xdb   : > { %1043 = vmatprep.subr.mxu1 %v1042_v57  ;;  %875 = vmatprep.subr.mxu0 %v2084_v37 }
  0xdc   : > { %1049 = vmatpush1.msra.mxu1 %v1048_v38  ;;  %1082 = vmatprep.mubr.f32.mxu1 %v2448_v48 }
  0xdd   : > { %877 = vmatpush1.msra.mxu0 %v2091_v56  ;;  %1599 = vmatmul.mubr.msk.f32.vlgmr.msra.gmra.mxu1 %vm195_vm0, %v2012_v47 }
  0xde   : > { %1212 = vmatprep.subr.mxu1 %v2044_v55  ;;  %879 = vmatprep.subr.mxu0 %v2098_v59 }
  0xdf   : > { %1214 = vmatpush1.msra.mxu1 %v2057_v42  ;;  %881 = vmatpush1.msra.mxu0 %v2117_v39 }
  0xe0   : > { %1216 = vmatprep.subr.mxu1 %v2061_v46  ;;  %883 = vmatprep.subr.mxu0 %v2126_v1 }
  0xe1   : > { %1218 = vmatpush1.msra.mxu1 %v2065_v52  ;;  %885 = vmatpush1.msra.mxu0 %v2135_v16 }
  0xe2   : > { %1220 = vmatprep.subr.mxu1 %v2069_v54  ;;  %887 = vmatprep.subr.mxu0 %v2145_v58 }
  0xe3   : > { %1222 = vmatpush1.msra.mxu1 %v2077_v43  ;;  %889 = vmatpush1.msra.mxu0 %v2157_v18 }
  0xe4   : > { %1224 = vmatprep.subr.mxu1 %v2084_v37  ;;  %891 = vmatprep.subr.mxu0 %v2169_v45 }
  0xe5   : > { %1226 = vmatpush1.msra.mxu1 %v2091_v56  ;;  %893 = vmatpush1.msra.mxu0 %v2181_v49 }
  0xe6   : > { %926 = vmatprep.mubr.f32.mxu0 %v2448_v48  ;;  %1228 = vmatprep.subr.mxu1 %v2098_v59 }
  0xe7   : > { %932 = vmatmul.mubr.f32.vlgmr.msra.gmra.mxu0 %v2033_v53  ;;  %1108 = vmatprep.subr.mxu0 %v2055_v41  ;;  %v2464_v53 = vand.u32 4294901760, %v2124_v5 }
  0xe8   : > { %1230 = vmatpush1.msra.mxu1 %v2117_v39  ;;  %1111 = vmatpush1.msra.mxu0 %v2075_v6 }
  0xe9   : > { %1232 = vmatprep.subr.mxu1 %v2126_v1  ;;  %1114 = vmatprep.subr.mxu0 %v2082_v10 }
  0xea   : > { %1234 = vmatpush1.msra.mxu1 %v2135_v16  ;;  %1117 = vmatpush1.msra.mxu0 %v2089_v11 }
  0xeb   : > { %1236 = vmatprep.subr.mxu1 %v2145_v58  ;;  %1120 = vmatprep.subr.mxu0 %v2096_v12 }
  0xec   : > { %1238 = vmatpush1.msra.mxu1 %v2157_v18  ;;  %1123 = vmatpush1.msra.mxu0 %v2109_v19 }
  0xed   : > { %1240 = vmatprep.subr.mxu1 %v2169_v45  ;;  %1126 = vmatprep.subr.mxu0 %v2115_v23 }
  0xee   : > { %1242 = vmatpush1.msra.mxu1 %v2181_v49  ;;  %1275 = vmatprep.mubr.f32.mxu1 %v2448_v48 }
  0xef   : > { %1129 = vmatpush1.msra.mxu0 %v2124_v5  ;;  %1279 = vmatmul.mubr.f32.vlgmr.msra.gmra.mxu1 %v2025_v51  ;;  %v2458_v51 = vand.u32 4294901760, %v2055_v41 }
  0xf0   : > { %1422 = vmatprep.subr.mxu1 %v2044_v55  ;;  %1132 = vmatprep.subr.mxu0 %v2133_v34  ;;  %v2465_v55 = vand.u32 4294901760, %v2133_v34 }
  0xf1   : > { %1424 = vmatpush1.msra.mxu1 %v2057_v42  ;;  %1135 = vmatpush1.msra.mxu0 %v2155_v61 }
  0xf2   : > { %1426 = vmatprep.subr.mxu1 %v2061_v46  ;;  %1138 = vmatprep.subr.mxu0 %v2167_v62 }
  0xf3   : > { %1428 = vmatpush1.msra.mxu1 %v2065_v52  ;;  %1141 = vmatpush1.msra.mxu0 %v2179_v63 }
  0xf4   : > { %1430 = vmatprep.subr.mxu1 %v2069_v54  ;;  %1144 = vmatprep.subr.mxu0 %v2190_v36 }
  0xf5   : > { %1432 = vmatpush1.msra.mxu1 %v2077_v43  ;;  %1147 = vmatpush1.msra.mxu0 %v2199_v17  ;;  %v2460_v43 = vand.u32 4294901760, %v2089_v11 }
  0xf6   : > { %1434 = vmatprep.subr.mxu1 %v2084_v37  ;;  %1150 = vmatprep.subr.mxu0 %v2210_v28  ;;  %v2459_v37 = vand.u32 4294901760, %v2082_v10 }
  0xf7   : > { %1436 = vmatpush1.msra.mxu1 %v2091_v56  ;;  %1153 = vmatpush1.msra.mxu0 %v2219_v15 }
  0xf8   : > { %1186 = vmatprep.mubr.f32.mxu0 %v2448_v48  ;;  %1438 = vmatprep.subr.mxu1 %v2098_v59 }
  0xf9   : > { %1189 = vmatmul.mubr.f32.vlgmr.msra.gmra.mxu0 %v2019_v50  ;;  %1304 = vmatprep.subr.mxu0 %v2458_v51  ;;  %v2461_v50 = vand.u32 4294901760, %v2096_v12 }
  0xfa   : > { %1440 = vmatpush1.msra.mxu1 %v2117_v39  ;;  %1308 = vmatpush1.msra.mxu0 %v962_v60  ;;  %v2462_v39 = vand.u32 4294901760, %v2109_v19 }
  0xfb   : > { %1442 = vmatprep.subr.mxu1 %v2126_v1  ;;  %1312 = vmatprep.subr.mxu0 %v2459_v37  ;;  %v2463_v1 = vand.u32 4294901760, %v2115_v23 }
  0xfc   : > { %1444 = vmatpush1.msra.mxu1 %v2135_v16  ;;  %1316 = vmatpush1.msra.mxu0 %v2460_v43 }
  0xfd   : > { %1446 = vmatprep.subr.mxu1 %v2145_v58  ;;  %1320 = vmatprep.subr.mxu0 %v2461_v50 }
  0xfe   : > { %1448 = vmatpush1.msra.mxu1 %v2157_v18  ;;  %1324 = vmatpush1.msra.mxu0 %v2462_v39 }
  0xff   : > { %1450 = vmatprep.subr.mxu1 %v2169_v45  ;;  %1328 = vmatprep.subr.mxu0 %v2463_v1 }
 0x100   : > { %1452 = vmatpush1.msra.mxu1 %v2181_v49  ;;  %1485 = vmatprep.mubr.f32.mxu1 %v2448_v48 }
 0x101   : > { %1332 = vmatpush1.msra.mxu0 %v2464_v53  ;;  %1601 = vmatmul.mubr.msk.f32.vlgmr.msra.gmra.mxu1 %vm195_vm0, %v2012_v47 }
 0x102   : > { %1336 = vmatprep.subr.mxu0 %v2465_v55  ;;  %1397 = vmatprep.mubr.f32.mxu0 %v2448_v48 }
 0x103   : > { %1340 = vmatpush1.msra.mxu0 %v1010_v27 }
 0x104   : > { %1344 = vmatprep.subr.mxu0 %v1016_v20 }
 0x105   : > { %1348 = vmatpush1.msra.mxu0 %v1022_v21 }
 0x106   : > { %1352 = vmatprep.subr.mxu0 %v1028_v44 }
 0x107   : > { %1356 = vmatpush1.msra.mxu0 %v1034_v30 }
 0x108   : > { %1360 = vmatprep.subr.mxu0 %v1040_v3 }
 0x109   : > { %1364 = vmatpush1.msra.mxu0 %v1046_v4 }
 0x10a   : > { %1600 = vmatmul.mubr.msk.f32.vlgmr.msra.gmra.mxu0 %vm195_vm0, %v2012_v47 }
 0x169   : > { %v438_v41 = vpop.f32.mrf.mxu1 }
 0x16b   : > { %v440_v52 = vpop.f32.mrf.mxu1 }
 0x172   : > { %v286_v34 = vpop.f32.mrf.mxu0 }
 0x173   : > { %v439_v54 = vadd.f32 %v438_v41, %v286_v34 }
 0x174   : > { %v288_v42 = vpop.f32.mrf.mxu0 }
 0x175   : > { %v441_v10 = vadd.f32 %v440_v52, %v288_v42 }
 0x179   : > { %v633_v5 = vpop.f32.mrf.mxu1 }
 0x17b   : > { %v635_v12 = vpop.f32.mrf.mxu1 }
 0x183   : > { %v543_v46 = vpop.f32.mrf.mxu0 }
 0x184   : > { %v544_v11 = vadd.f32 %v543_v46, %v439_v54 }
 0x185   : > { %v545_v6 = vpop.f32.mrf.mxu0 }
 0x186   : > { %v546_v56 = vadd.f32 %v545_v6, %v441_v10  ;;  %v634_v59 = vadd.f32 %v633_v5, %v544_v11 }
 0x188   : > { %v636_v45 = vadd.f32 %v635_v12, %v546_v56 }
 0x18b   : > { %v841_v60 = vpop.f32.mrf.mxu1 }
 0x18d   : > { %v843_v16 = vpop.f32.mrf.mxu1 }
 0x195   : > { %v753_v19 = vpop.f32.mrf.mxu0 }
 0x196   : > { %v754_v47 = vadd.f32 %v753_v19, %v634_v59 }
 0x197   : > { %v755_v23 = vpop.f32.mrf.mxu0 }
 0x198   : > { %v842_v49 = vadd.f32 %v841_v60, %v754_v47  ;;  %v756_v48 = vadd.f32 %v755_v23, %v636_v45 }
 0x19a   : > { %v1493_v58 = vmul.f32 22.627417, %v842_v49  ;;  %v844_v28 = vadd.f32 %v843_v16, %v756_v48 }
 0x19c   : > { %1497 = vst [vmem:[%s2377_s8] sm:$0xff] %v1493_v58  ;;  %v1494_v61 = vmul.f32 22.627417, %v844_v28 }
 0x19d   : > { %v1085_v62 = vpop.f32.mrf.mxu1 }
 0x19e   : > { %1498 = vst [vmem:[%s2377_s8 + $0x8] sm:$0xff] %v1494_v61 }
 0x19f   : > { %v1087_v36 = vpop.f32.mrf.mxu1 }
 0x1a7   : > { %v933_v18 = vpop.f32.mrf.mxu0 }
 0x1a8   : > { %v1086_v27 = vadd.f32 %v1085_v62, %v933_v18 }
 0x1a9   : > { %v935_v30 = vpop.f32.mrf.mxu0 }
 0x1aa   : > { %v1088_v21 = vadd.f32 %v1087_v36, %v935_v30 }
 0x1af   : > { %v1280_v17 = vpop.f32.mrf.mxu1 }
 0x1b1   : > { %v1282_v2 = vpop.f32.mrf.mxu1 }
 0x1b9   : > { %v1190_v63 = vpop.f32.mrf.mxu0 }
 0x1ba   : > { %v1191_v15 = vadd.f32 %v1190_v63, %v1086_v27 }
 0x1bb   : > { %v1192_v20 = vpop.f32.mrf.mxu0 }
 0x1bc   : > { %v1193_v44 = vadd.f32 %v1192_v20, %v1088_v21  ;;  %v1281_v29 = vadd.f32 %v1280_v17, %v1191_v15 }
 0x1be   : > { %v1283_v14 = vadd.f32 %v1282_v2, %v1193_v44 }
 0x1c1   : > { %v1488_v3 = vpop.f32.mrf.mxu1 }
 0x1c3   : > { %v1490_v25 = vpop.f32.mrf.mxu1 }
 0x1ca   : > { %v1400_v7 = vpop.f32.mrf.mxu0 }
 0x1cb   : > { %v1401_v26 = vadd.f32 %v1400_v7, %v1281_v29 }
 0x1cc   : > { %v1402_v4 = vpop.f32.mrf.mxu0 }
 0x1cd   : > { %v1489_v8 = vadd.f32 %v1488_v3, %v1401_v26  ;;  %v1403_v35 = vadd.f32 %v1402_v4, %v1283_v14 }
 0x1cf   : > { %v1495_v9 = vmul.f32 22.627417, %v1489_v8  ;;  %v1491_v13 = vadd.f32 %v1490_v25, %v1403_v35 }
 0x1d1   : > { %1499 = vst [vmem:[%s2377_s8 + $0x10] sm:$0xff] %v1495_v9  ;;  %v1496_v31 = vmul.f32 22.627417, %v1491_v13 }
 0x1d3   : > { %1500 = vst [vmem:[%s2377_s8 + $0x18] sm:$0xff] %v1496_v31 }
 0x1d4   : > { %1702 = shalt.err (!%p1699_p0)
}
 0x1d5   : > { %s1703_s27 = scalar_lea.hbm %s1514_s22, 512  ;;  %s1707_s30 = scalar_lea.hbm %s2421_s2, 1024 }
 0x1d6   : > { %p1704_p1 = scmp.ne.s32.totalorder %s1514_s22, %s1703_s27  ;;  %p1708_p4 = scmp.lt.s32.totalorder %s1514_s22, %s2421_s2 }
 0x1d7   : > { %p1709_p7 = scmp.lt.s32.totalorder %s1707_s30, %s1703_s27 }
 0x1d8   : > { %p1705_p2 = pnand %p1704_p1, %p1814_p5 }
 0x1d9   : > { %p1710_p8 = por %p1709_p7, %p1708_p4 }
 0x1da   : > { %p1706_p3 = pneg %p1705_p2 }
 0x1dc   : > { %p1711_p6 = pnand %p1710_p8, %p1706_p3 }
 0x1de   : > { %1714 = shalt.err (!%p1711_p6)
}
 0x1df   : > { %1612 = dma.vmem_to_hbm [thread:$0]  (%p1814_p5), %s1517_s16, 512, %s1514_s22, %s1502_s23  }
 0x1e0 PF: > { %p1624_p9 = scmp.ge.s32.totalorder %s1753_s12, 2  ;;  %s1528_s5 = sand.u32 1, %s1741_s9  }
 0x1e1   : > { %p2466_p10 = scmp.ne.s32.totalorder %s2444_s20, 0  ;;  %s1529_s6 = scalar_lea.sflag [#allocation4], %s1528_s5 }
 0x1e3   : > { %p1619_p11 = pnand %p1624_p9, %p2466_p10 }
 0x1e5   : > { %p1620_p12 = pneg %p1619_p11 }
 0x1e7   : > { %1736 = dma.done.wait (%p1620_p12), %s1529_s6, 512  }
 0x1e8   : > { %1738 = vsyncadd (%p1620_p12), %s1529_s6, 4294966784  ;;  %p13_p13 = scmp.ge.s32.totalorder %s1801_s15, 4   ;;  %s2467_s9 = smov %s1745_s10 }
 0x1e9   : > { %s2468_s10 = smov %s1749_s11  ;;  %s2469_s11 = smov %s1812_s18 }
 0x1ea   : > { %s2470_s12 = smov %s1801_s15  ;;  %15 = sbr.rel (!%p13_p13) target bundleno = 4 (0x4), region = 68 }
 0x1ef   :  { %1534 = vsyncpa [#allocation3], 1 }
 0x1f0   :  { %1536 = vsyncpa [#allocation3 + $0x1], 1 }
 0x1f1   :  { %1537 = vsyncpa [#allocation4], 1 }
 0x1f2   :  { %1539 = vsyncpa [#allocation4 + $0x1], 1 }

</bundles_post_ra>
